<compile_context>
chip_gen: v7x
topology: tpu7x:2x2x1
jax: 0.10.0
libtpu: 0.0.40
codegen_flags: <defaults>
</compile_context>

<pallas_src>
import jax
import jax.numpy as jnp
from jax import lax
from jax.experimental import pallas as pl
from jax.experimental.pallas import tpu as pltpu


def _round_up(x, m):
    return ((x + m - 1) // m) * m


def _physical_vmem_bytes():
    # 128 MiB on v5e/v6e, 64 MiB per TensorCore on v7x. Fall back to the
    # smallest (v7x) so the auto-tiling is safe on any generation.
    try:
        return int(pltpu.get_tpu_info().vmem_capacity_bytes)
    except Exception:
        return 64 * 1024 * 1024


# ---------------------------------------------------------------------------
# Kernel bodies
# ---------------------------------------------------------------------------

def _ffn_kernel_fused(x_ref, w1_ref, b1_ref, w2t_ref, b2_ref, o_ref):
    # Single F chunk (weights resident): no accumulator scratch, no epilogue copy.
    # x_ref: (tm, Hp)  w1_ref: (Fp, Hp)  b1_ref: (1, Fp)
    # w2t_ref: (Fp, Hp)  b2_ref: (1, Hp)  o_ref: (tm, Hp)
    h = lax.dot_general(
        x_ref[...], w1_ref[...],
        dimension_numbers=(((1,), (1,)), ((), ())),
        preferred_element_type=jnp.float32)
    h = jnp.maximum(h + b1_ref[...], 0.0)
    # TODO(synk): dropout is identity in eval mode (PyTorch inference); training-mode
    # dropout would use pltpu.prng_seed + pltpu.prng_random_bits masking here.
    y = lax.dot_general(
        h.astype(w2t_ref.dtype), w2t_ref[...],
        dimension_numbers=(((1,), (0,)), ((), ())),
        preferred_element_type=jnp.float32)
    o_ref[...] = (y + b2_ref[...]).astype(o_ref.dtype)


def _ffn_kernel_chunked(x_ref, w1_ref, b1_ref, w2t_ref, b2_ref, o_ref, acc_ref):
    # grid = (M tiles ["parallel"], F chunks ["arbitrary", innermost]).
    # Fused per-chunk:  acc += ReLU(x @ W1[f0:f1,:]^T + b1[f0:f1]) @ W2t[f0:f1,:]
    f = pl.program_id(1)

    @pl.when(f == 0)
    def _():
        acc_ref[...] = jnp.zeros_like(acc_ref)

    h = lax.dot_general(
        x_ref[...], w1_ref[...],
        dimension_numbers=(((1,), (1,)), ((), ())),
        preferred_element_type=jnp.float32)
    h = jnp.maximum(h + b1_ref[...], 0.0)

    acc_ref[...] += lax.dot_general(
        h.astype(w2t_ref.dtype), w2t_ref[...],
        dimension_numbers=(((1,), (0,)), ((), ())),
        preferred_element_type=jnp.float32)

    @pl.when(f == pl.num_programs(1) - 1)
    def _():
        o_ref[...] = (acc_ref[...] + b2_ref[...]).astype(o_ref.dtype)


# ---------------------------------------------------------------------------
# Tile selection
# ---------------------------------------------------------------------------

def _estimate_vmem(tm, tf, n_f, Hp, in_bytes, out_bytes):
    return (2 * tm * Hp * in_bytes          # x tile, double buffered
            + 2 * 2 * tf * Hp * in_bytes    # W1 + W2 chunks, double buffered
            + 2 * (tf + Hp) * 4             # bias chunks
            + 2 * tm * Hp * out_bytes       # output tile, double buffered
            + (tm * Hp * 4 if n_f > 1 else 0)   # f32 accumulator scratch
            + tm * tf * 4)                  # intermediate ReLU chunk


def _choose_tiles(M, Hp, Fp, in_bytes, out_bytes, pack, budget,
                  tile_m=None, tile_f=None):
    m_cap = _round_up(max(M, 1), pack)

    # F chunk candidates: full F first (weights resident -> single HBM pass over
    # the weights), then progressively smaller chunks.
    if tile_f is not None:
        tf_cands = [min(_round_up(tile_f, 128), Fp)]
    else:
        tf_cands, t = [Fp], Fp
        while t > 512:
            t = max(512, _round_up(t // 2, 256))
            tf_cands.append(t)
        if Fp > 256 and 256 not in tf_cands:
            tf_cands.append(256)

    # Row-tile candidates, largest first: amortizes weight re-streaming when the
    # weights do not stay resident.
    if tile_m is not None:
        tm_cands = [min(_round_up(tile_m, pack), m_cap)]
    else:
        tm_cands = sorted({min(_round_up(t, pack), m_cap)
                           for t in (1024, 768, 512, 384, 256, 128, 64, 32, 16, 8)},
                          reverse=True)

    chosen = (tm_cands[-1], tf_cands[-1])
    for tf in tf_cands:
        n_f = pl.cdiv(Fp, tf)
        done = False
        for tm in tm_cands:
            if _estimate_vmem(tm, tf, n_f, Hp, in_bytes, out_bytes) <= budget:
                chosen = (tm, tf)
                done = True
                break
        if done:
            break

    tm, tf = chosen
    # v7x shards the "parallel" M axis across its 2 TensorCores: make sure there
    # are at least 2 row tiles whenever the row count allows it.
    if tile_m is None and M >= 2 * pack and pl.cdiv(M, tm) < 2:
        tm = _round_up(pl.cdiv(M, 2), pack)
    return tm, tf


# ---------------------------------------------------------------------------
# Wrapper
# ---------------------------------------------------------------------------

def feed_forward_network(x, w1, b1, w2, b2, *, tile_m=None, tile_f=None,
                         matmul_dtype=None):
    """x: (..., hidden). w1: (filter, hidden), w2: (hidden, filter) in PyTorch
    nn.Linear (out_features, in_features) layout. b1: (filter,), b2: (hidden,).
    matmul_dtype: optional cast dtype for the MXU matmuls (e.g. jnp.bfloat16,
    recommended for production); accumulation stays f32. tile_m / tile_f default
    to an auto-derived, VMEM-aware tiling."""
    orig_shape = x.shape
    hidden = orig_shape[-1]
    filt = w1.shape[0]
    assert w1.shape == (filt, hidden)
    assert w2.shape == (hidden, filt)

    M = 1
    for d in orig_shape[:-1]:
        M *= d

    mm_dtype = x.dtype if matmul_dtype is None else matmul_dtype
    out_dtype = x.dtype
    in_bytes = jnp.dtype(mm_dtype).itemsize
    out_bytes = jnp.dtype(out_dtype).itemsize
    # Sublane packing: 8 rows for f32, 16 for bf16, 32 for 8-bit types.
    pack = max(8, 32 // in_bytes, 32 // out_bytes)

    # Lane padding: 128 minimum; 256 when already >128 (v6e/v7x MXU is 256x256).
    Hp = _round_up(hidden, 128)
    if Hp > 128:
        Hp = _round_up(hidden, 256)
    Fp = _round_up(filt, 128)
    if Fp > 128:
        Fp = _round_up(filt, 256)

    phys_vmem = _physical_vmem_bytes()
    budget = int(phys_vmem * 0.7)        # headroom for Mosaic internal scratch
    tm, tf = _choose_tiles(M, Hp, Fp, in_bytes, out_bytes, pack, budget,
                           tile_m=tile_m, tile_f=tile_f)
    Fp = _round_up(Fp, tf)
    n_f = Fp // tf
    Mp = _round_up(max(M, 1), tm)
    grid = (Mp // tm, n_f)

    est = _estimate_vmem(tm, tf, n_f, Hp, in_bytes, out_bytes)
    vmem_limit = int(min(phys_vmem * 0.8, max(int(est * 1.5), 32 * 1024 * 1024)))

    # One-time layout prep (constant-foldable for inference weights):
    # both weight operands presented (filter, hidden)-major so weight-chunk DMAs
    # slice the sublane axis (contiguous lane-dense rows).
    x2d = x.reshape(M, hidden).astype(mm_dtype)
    w1c = w1.astype(mm_dtype)
    w2t = w2.T.astype(mm_dtype)                       # (filter, hidden)
    b1c = b1.astype(jnp.float32).reshape(1, filt)
    b2c = b2.astype(jnp.float32).reshape(1, hidden)

    if Mp != M or Hp != hidden:
        x2d = jnp.pad(x2d, ((0, Mp - M), (0, Hp - hidden)))
    if Fp != filt or Hp != hidden:
        w1c = jnp.pad(w1c, ((0, Fp - filt), (0, Hp - hidden)))
        w2t = jnp.pad(w2t, ((0, Fp - filt), (0, Hp - hidden)))
    if Fp != filt:
        b1c = jnp.pad(b1c, ((0, 0), (0, Fp - filt)))
    if Hp != hidden:
        b2c = jnp.pad(b2c, ((0, 0), (0, Hp - hidden)))

    if n_f > 1:
        kernel = _ffn_kernel_chunked
        scratch = [pltpu.VMEM((tm, Hp), jnp.float32)]
    else:
        kernel = _ffn_kernel_fused
        scratch = []

    out2d = pl.pallas_call(
        kernel,
        out_shape=jax.ShapeDtypeStruct((Mp, Hp), out_dtype),
        grid_spec=pltpu.PrefetchScalarGridSpec(
            num_scalar_prefetch=0,
            grid=grid,
            in_specs=[
                pl.BlockSpec((tm, Hp), lambda i, f: (i, 0)),   # x rows
                pl.BlockSpec((tf, Hp), lambda i, f: (f, 0)),   # W1 chunk (out, in)
                pl.BlockSpec((1, tf), lambda i, f: (0, f)),    # b1 chunk
                pl.BlockSpec((tf, Hp), lambda i, f: (f, 0)),   # W2^T chunk (filter, hidden)
                pl.BlockSpec((1, Hp), lambda i, f: (0, 0)),    # b2
            ],
            out_specs=pl.BlockSpec((tm, Hp), lambda i, f: (i, 0)),
            scratch_shapes=scratch,
        ),
        compiler_params=pltpu.CompilerParams(
            dimension_semantics=("parallel", "arbitrary"),
            vmem_limit_bytes=vmem_limit,
        ),
    )(x2d, w1c, b1c, w2t, b2c)

    out2d = out2d[:M, :hidden]
    return out2d.reshape(orig_shape)


def xavier_uniform(key, out_features, in_features, dtype=jnp.float32):
    # Matches torch.nn.init.xavier_uniform_ (gain=1).
    limit = (6.0 / (in_features + out_features)) ** 0.5
    return jax.random.uniform(key, (out_features, in_features), dtype,
                              minval=-limit, maxval=limit)


if __name__ == "__main__":
    # Small shapes consistent with the PyTorch module.
    hidden_size = 32
    filter_size = 64
    batch, seq = 2, 8

    key = jax.random.PRNGKey(0)
    k_x, k_w1, k_w2 = jax.random.split(key, 3)

    x = jax.random.normal(k_x, (batch, seq, hidden_size), jnp.float32)

    # Parameters initialized exactly as FeedForwardNetwork.__init__ does:
    # xavier_uniform weights, zero biases. Dropout is identity at inference.
    w1 = xavier_uniform(k_w1, filter_size, hidden_size)   # layer1.weight (out, in)
    b1 = jnp.zeros((filter_size,), jnp.float32)           # layer1.bias
    w2 = xavier_uniform(k_w2, hidden_size, filter_size)   # layer2.weight (out, in)
    b2 = jnp.zeros((hidden_size,), jnp.float32)           # layer2.bias

    ref = jnp.maximum(x @ w1.T + b1, 0.0) @ w2.T + b2

    # f32 path, auto tiling (weights-resident fast path) — tight check.
    out = feed_forward_network(x, w1, b1, w2, b2)
    out = jax.block_until_ready(out)
    assert out.shape == (batch, seq, hidden_size)
    assert jnp.allclose(out, ref, atol=1e-5, rtol=1e-5)

    # bf16 matmul path (f32 accumulation) — looser tolerance.
    out_bf16 = feed_forward_network(x, w1, b1, w2, b2, matmul_dtype=jnp.bfloat16)
    out_bf16 = jax.block_until_ready(out_bf16)
    assert jnp.allclose(out_bf16, ref, atol=1e-1, rtol=1e-1)

    # Larger, non-aligned row count: exercises row padding and both the
    # weights-resident path (default) and the chunked-F accumulator path.
    batch2, seq2, hidden2, filter2 = 3, 50, 128, 512
    kx2, kw1b, kw2b = jax.random.split(jax.random.PRNGKey(1), 3)
    x_big = jax.random.normal(kx2, (batch2, seq2, hidden2), jnp.float32)
    w1_big = xavier_uniform(kw1b, filter2, hidden2)
    b1_big = jnp.zeros((filter2,), jnp.float32)
    w2_big = xavier_uniform(kw2b, hidden2, filter2)
    b2_big = jnp.zeros((hidden2,), jnp.float32)
    ref_big = jnp.maximum(x_big @ w1_big.T + b1_big, 0.0) @ w2_big.T + b2_big

    out_big = feed_forward_network(x_big, w1_big, b1_big, w2_big, b2_big)
    out_big = jax.block_until_ready(out_big)
    assert jnp.allclose(out_big, ref_big, atol=1e-3, rtol=1e-3)

    out_big_chunked = feed_forward_network(x_big, w1_big, b1_big, w2_big, b2_big,
                                           tile_f=128)
    out_big_chunked = jax.block_until_ready(out_big_chunked)
    assert jnp.allclose(out_big_chunked, ref_big, atol=1e-3, rtol=1e-3)

    print("KERNEL_OK")
</pallas_src>

<mosaic_0001>
module attributes {stable_mosaic.version = 11 : i64} {
  func.func @_ffn_kernel_fused(%arg0: i32, %arg1: i32, %arg2: memref<8x128xf32, #tpu.memory_space<vmem>>, %arg3: memref<128x128xf32, #tpu.memory_space<vmem>>, %arg4: memref<1x128xf32, #tpu.memory_space<vmem>>, %arg5: memref<128x128xf32, #tpu.memory_space<vmem>>, %arg6: memref<1x128xf32, #tpu.memory_space<vmem>>, %arg7: memref<8x128xf32, #tpu.memory_space<vmem>>) attributes {dimension_semantics = [#tpu.dimension_semantics<parallel>, #tpu.dimension_semantics<arbitrary>], iteration_bounds = array<i64: 2, 1>, scalar_prefetch = 0 : i64, scratch_operands = 0 : i64, tpu.core_type = #tpu.core_type<tc>, window_params = [{transform_indices = @transform_0, window_bounds = array<i64: 8, 128>}, {transform_indices = @transform_1, window_bounds = array<i64: 128, 128>}, {transform_indices = @transform_2, window_bounds = array<i64: 1, 128>}, {transform_indices = @transform_3, window_bounds = array<i64: 128, 128>}, {pipeline_mode = #tpu.pipeline_mode<synchronous>, transform_indices = @transform_4, window_bounds = array<i64: 1, 128>}, {transform_indices = @transform_5, window_bounds = array<i64: 8, 128>}]} {
    %c0 = arith.constant 0 : index
    %c0_0 = arith.constant 0 : index
    %0 = vector.load %arg2[%c0, %c0_0] : memref<8x128xf32, #tpu.memory_space<vmem>>, vector<8x128xf32>
    %c0_1 = arith.constant 0 : index
    %c0_2 = arith.constant 0 : index
    %1 = vector.load %arg3[%c0_1, %c0_2] : memref<128x128xf32, #tpu.memory_space<vmem>>, vector<128x128xf32>
    %cst = arith.constant dense<0.000000e+00> : vector<8x128xf32>
    %2 = tpu.matmul %0, %1, %cst {dimension_numbers = #tpu.dot_dimension_numbers<[1], [1], [0], [0], [0, 0, 1, 0], [], []>} : vector<8x128xf32>, vector<128x128xf32>, vector<8x128xf32> -> vector<8x128xf32>
    %c0_3 = arith.constant 0 : index
    %c0_4 = arith.constant 0 : index
    %3 = vector.load %arg4[%c0_3, %c0_4] : memref<1x128xf32, #tpu.memory_space<vmem>>, vector<1x128xf32>
    %4 = vector.broadcast %3 : vector<1x128xf32> to vector<8x128xf32>
    %5 = arith.addf %2, %4 : vector<8x128xf32>
    %cst_5 = arith.constant 0.000000e+00 : f32
    %6 = vector.broadcast %cst_5 : f32 to vector<8x128xf32>
    %7 = arith.maximumf %5, %6 : vector<8x128xf32>
    %c0_6 = arith.constant 0 : index
    %c0_7 = arith.constant 0 : index
    %8 = vector.load %arg5[%c0_6, %c0_7] : memref<128x128xf32, #tpu.memory_space<vmem>>, vector<128x128xf32>
    %cst_8 = arith.constant dense<0.000000e+00> : vector<8x128xf32>
    %9 = tpu.matmul %7, %8, %cst_8 {dimension_numbers = #tpu.dot_dimension_numbers<[1], [0], [0], [1], [0, 0, 1, 1], [], []>} : vector<8x128xf32>, vector<128x128xf32>, vector<8x128xf32> -> vector<8x128xf32>
    %c0_9 = arith.constant 0 : index
    %c0_10 = arith.constant 0 : index
    %10 = vector.load %arg6[%c0_9, %c0_10] : memref<1x128xf32, #tpu.memory_space<vmem>>, vector<1x128xf32>
    %11 = vector.broadcast %10 : vector<1x128xf32> to vector<8x128xf32>
    %12 = arith.addf %9, %11 : vector<8x128xf32>
    %c0_11 = arith.constant 0 : index
    %c0_12 = arith.constant 0 : index
    %13 = vector.load %arg7[%c0_11, %c0_12] : memref<8x128xf32, #tpu.memory_space<vmem>>, vector<8x128xf32>
    tpu.vector_store %arg7[%c0_11, %c0_12], %12 {strides = array<i32>} : memref<8x128xf32, #tpu.memory_space<vmem>>, vector<8x128xf32>,
    return
  }
  func.func @transform_0(%arg0: i32, %arg1: i32) -> (i32, i32) {
    %c0_i32 = arith.constant 0 : i32
    %c0_i32_0 = arith.constant 0 : i32
    return %arg0, %c0_i32 : i32, i32
  }
  func.func @transform_1(%arg0: i32, %arg1: i32) -> (i32, i32) {
    %c0_i32 = arith.constant 0 : i32
    %c0_i32_0 = arith.constant 0 : i32
    return %arg1, %c0_i32 : i32, i32
  }
  func.func @transform_2(%arg0: i32, %arg1: i32) -> (i32, i32) {
    %c0_i32 = arith.constant 0 : i32
    %c0_i32_0 = arith.constant 0 : i32
    return %c0_i32, %arg1 : i32, i32
  }
  func.func @transform_3(%arg0: i32, %arg1: i32) -> (i32, i32) {
    %c0_i32 = arith.constant 0 : i32
    %c0_i32_0 = arith.constant 0 : i32
    return %arg1, %c0_i32 : i32, i32
  }
  func.func @transform_4(%arg0: i32, %arg1: i32) -> (i32, i32) {
    %c0_i32 = arith.constant 0 : i32
    %c0_i32_0 = arith.constant 0 : i32
    %c0_i32_1 = arith.constant 0 : i32
    return %c0_i32, %c0_i32_0 : i32, i32
  }
  func.func @transform_5(%arg0: i32, %arg1: i32) -> (i32, i32) {
    %c0_i32 = arith.constant 0 : i32
    %c0_i32_0 = arith.constant 0 : i32
    return %arg0, %c0_i32 : i32, i32
  }
}

</mosaic_0001>

<bundles_post_ra>
// kernel: tpu_custom_call.1
= control target key start
LH: loop header
LB: loop body
LE: loop exit
PB: predicated region body
PF: predicated region fallthrough
CT: control target
= control target key end

     0   :  { %10 = vsyncpa [#allocation3], 0  ;;  %s1381_s0 = inlined_call_operand.hbm [shape: f32[16,128], index: 0, kind: input, shape index: {}]   ;;  %s1382_s1 = inlined_call_operand.hbm [shape: f32[128,128], index: 1, kind: input, shape index: {}]   ;;  %s1383_s2 = inlined_call_operand.vmem [shape: f32[1,128], index: 2, kind: input, shape index: {}]   ;;  %s1384_s3 = inlined_call_operand.hbm [shape: f32[128,128], index: 3, kind: input, shape index: {}]   ;;  %s1385_s4 = inlined_call_operand.vmem [shape: f32[1,128], index: 4, kind: input, shape index: {}]   ;;  %s1386_s5 = inlined_call_operand.hbm [shape: f32[16,128], index: 5, kind: output, shape index: {}]  }
   0x1   :  { %12 = vsyncpa [#allocation3 + $0x1], 0 }
   0x2   :  { %13 = vsyncpa [#allocation6], 0 }
   0x3   :  { %14 = vsyncpa [#allocation4], 0 }
   0x4   :  { %16 = vsyncpa [#allocation4 + $0x1], 0  ;;  %s1102_s18 = smov 0   ;;  %s1104_s19 = smov 0  }
   0x5   :  { %s1106_s20 = smov 0   ;;  %s1108_s21 = smov 0  }
   0x6   :  { %s1110_s22 = smov 0   ;;  %s1112_s23 = smov 0  }
   0x7 LB: > { %s629_s24 = sadd.s32 4294967295, %s1061_s23   ;;  %s630_s25 = sadd.s32 4294967294, %s1061_s23   ;;  %s1061_s23 = sphi %s1112_s23, %s22_s23   ;;  %s1057_s22 = sphi %s1110_s22, %s1408_s22   ;;  %s1053_s21 = sphi %s1108_s21, %s1407_s21   ;;  %s1049_s20 = sphi %s1106_s20, %s1406_s20   ;;  %s1045_s19 = sphi %s1104_s19, %s1405_s19   ;;  %s1041_s18 = sphi %s1102_s18, %s1404_s18  }
   0x8   : > { %p54_p0 = scmp.ne.s32.totalorder %s1045_s19, %s1041_s18  ;;  %p1136_p1 = scmp.eq.s32.totalorder %s629_s24, 0 }
   0x9   : > { %p1140_p2 = scmp.eq.s32.totalorder %s629_s24, 1  ;;  %p183_p3 = scmp.eq.s32.totalorder %s630_s25, 1 }
   0xa   : > { %s1391_s26 = scalar_select %p1136_p1, 1, 0 }
   0xb   : > { %p1146_p4 = por %p1136_p1, %p54_p0  ;;  %p631_p5 = scmp.ge.s32.totalorder %s1061_s23, 1 }
   0xc   : > { %p1151_p6 = por %p183_p3, %p54_p0  ;;  %p190_p7 = scmp.lt.s32.totalorder %s1061_s23, 3 }
   0xd   : > { %s1393_s28 = scalar_select %p1146_p4, 1, 0 }
   0xe   : > { %s1394_s29 = scalar_select %p1151_p6, 1, 0 }
   0xf   : > { %p1156_p8 = pnand %p631_p5, %p190_p7  ;;  %s1063_s6 = smov [#allocation5]  }
  0x10   : > { %s205_s7 = sshll.u32 %s1063_s6, 4  ;;  %s1064_s9 = smov [#allocation7]   ;;  %s1160_s7 = int_to_ptr.vmem [resolvable:$true] %s205_s7 }
  0x11   : > { %p813_p9 = pneg %p1156_p8  ;;  %s227_s10 = sshll.u32 %s1064_s9, 4  ;;  %s1171_s10 = int_to_ptr.vmem [resolvable:$true] %s227_s10 }
  0x12   : > { %s889_s13 = scalar_lea.hbm %s1382_s1, 2048 }
  0x13   : > { %p1167_p11 = pnand %p813_p9, %p1136_p1  ;;  %p890_p12 = scmp.ne.s32.totalorder %s1382_s1, %s889_s13 }
  0x14   : > { %p896_p5 = scmp.lt.u32.totalorder %s889_s13, %s1382_s1 }
  0x15   : > { %p891_p13 = pneg %p1167_p11 }
  0x17   : > { %p892_p0 = pnand %p891_p13, %p890_p12 }
  0x19   : > { %p893_p3 = pneg %p892_p0 }
  0x1b   : > { %p898_p7 = pnand %p896_p5, %p893_p3 }
  0x1d   : > { %901 = shalt.err (!%p898_p7)
}
  0x1e   : > { %s902_s24 = scalar_lea.vmem %s1160_s7, 2048  ;;  %p910_p1 = scmp.lt.s32.totalorder %s1160_s7, %s1160_s7 }
  0x1f   : > { %p903_p9 = scmp.ne.s32.totalorder %s1160_s7, %s902_s24  ;;  %p911_p12 = scmp.lt.s32.totalorder %s902_s24, %s902_s24 }
  0x21   : > { %p905_p10 = pnand %p903_p9, %p891_p13  ;;  %p912_p0 = por %p911_p12, %p910_p1 }
  0x23   : > { %p906_p6 = pneg %p905_p10 }
  0x25   : > { %p913_p4 = pnand %p912_p0, %p906_p6 }
  0x27   : > { %916 = shalt.err (!%p913_p4)
}
  0x28   : > { %s1065_s25 = smov 128   ;;  %s1066_s6 = smov 8  }
  0x29   : > { %816 = dma.hbm_to_vmem [thread:$0]  (!%p1167_p11), %s1382_s1, 2048, %s1160_s7, [#allocation6], %s1065_s25, %s1065_s25, %s1066_s6  }
  0x2a   : > { %s917_s14 = scalar_lea.hbm %s1384_s3, 2048 }
  0x2b   : > { %p918_p1 = scmp.ne.s32.totalorder %s1384_s3, %s917_s14  ;;  %p924_p10 = scmp.lt.u32.totalorder %s917_s14, %s1384_s3 }
  0x2d   : > { %p920_p4 = pnand %p918_p1, %p891_p13 }
  0x2f   : > { %p921_p6 = pneg %p920_p4 }
  0x31   : > { %p926_p3 = pnand %p924_p10, %p921_p6 }
  0x33   : > { %929 = shalt.err (!%p926_p3)
}
  0x34   : > { %s930_s7 = scalar_lea.vmem %s1171_s10, 2048  ;;  %p938_p12 = scmp.lt.s32.totalorder %s1171_s10, %s1171_s10 }
  0x35   : > { %p931_p5 = scmp.ne.s32.totalorder %s1171_s10, %s930_s7  ;;  %p939_p0 = scmp.lt.s32.totalorder %s930_s7, %s930_s7 }
  0x37   : > { %p933_p7 = pnand %p931_p5, %p891_p13  ;;  %p940_p1 = por %p939_p0, %p938_p12 }
  0x39   : > { %p934_p9 = pneg %p933_p7 }
  0x3b   : > { %p941_p4 = pnand %p940_p1, %p934_p9 }
  0x3d   : > { %944 = shalt.err (!%p941_p4)
}
  0x3e   : > { %819 = dma.hbm_to_vmem [thread:$0]  (!%p1167_p11), %s1384_s3, 2048, %s1171_s10, [#allocation6], %s1065_s25, %s1065_s25, %s1066_s6  }
  0x3f   : > { %s34_s12 = sadd.s32 1, %s1057_s22  ;;  %s41_s13 = sadd.s32 1, %s1049_s20 }
  0x40   : > { %p36_p13 = scmp.ge.s32.totalorder %s34_s12, 2  ;;  %p48_p6 = scmp.ne.s32.totalorder %s1049_s20, %s1045_s19 }
  0x41   : > { %p49_p10 = scmp.eq.s32.totalorder %s1061_s23, 0  ;;  %p830_p3 = scmp.lt.s32.totalorder %s1061_s23, 2 }
  0x42   : > { %s1410_s12 = smov (%p36_p13, %s34_s12), 0  ;;  %p1235_p7 = por %p1140_p2, %p48_p6 }
  0x43   : > { %p50_p5 = por %p49_p10, %p48_p6  ;;  %s38_s14 = ssub.s32 %s1057_s22, %s1410_s12 }
  0x44   : > { %s1397_s8 = scalar_select %p1235_p7, 1, 0 }
  0x45   : > { %s244_s15 = sand.u32 1, %s1049_s20   ;;  %p39_p9 = scmp.eq.s32.totalorder %s38_s14, 0 }
  0x46   : > { %s636_s10 = sshll.u32 %s244_s15, 3  ;;  %s637_s25 = sshll.u32 %s1057_s22, 7 }
  0x47   : > { %s1244_s6 = scalar_select %p39_p9, %s1049_s20, %s41_s13  }
  0x48   : > { %s1249_s24 = scalar_lea.hbm %s1381_s0, %s637_s25  ;;  %s248_s27 = scalar_lea.vmem [#allocation2], %s636_s10 }
  0x49   : > { %s255_s7 = sshll.u32 %s248_s27, 4  ;;  %p1253_p2 = pnand %p830_p3, %p50_p5  ;;  %s1257_s7 = int_to_ptr.vmem [resolvable:$true] %s255_s7 }
  0x4a   : > { %s245_s11 = scalar_lea.sflag [#allocation3], %s244_s15  ;;  %s945_s13 = scalar_lea.hbm %s1249_s24, 128 }
  0x4b   : > { %p946_p11 = scmp.ne.s32.totalorder %s1249_s24, %s945_s13  ;;  %p947_p12 = pneg %p1253_p2 }
  0x4c   : > { %s950_s25 = scalar_lea.hbm %s1381_s0, 256  ;;  %p951_p4 = scmp.lt.u32.totalorder %s1249_s24, %s1381_s0 }
  0x4d   : > { %p948_p0 = pnand %p947_p12, %p946_p11  ;;  %p952_p13 = scmp.lt.u32.totalorder %s950_s25, %s945_s13 }
  0x4e   : > { %p954_p10 = scmp.lt.u32.totalorder %s945_s13, %s1249_s24 }
  0x4f   : > { %p949_p1 = pneg %p948_p0  ;;  %p953_p6 = por %p952_p13, %p951_p4 }
  0x51   : > { %p955_p3 = por %p954_p10, %p953_p6 }
  0x53   : > { %p956_p5 = pnand %p955_p3, %p949_p1 }
  0x55   : > { %959 = shalt.err (!%p956_p5)
}
  0x56   : > { %s960_s15 = scalar_lea.vmem %s1257_s7, 128  ;;  %s1067_s27 = smov [#allocation2]  }
  0x57   : > { %p961_p9 = scmp.ne.s32.totalorder %s1257_s7, %s960_s15  ;;  %s965_s14 = sshll.u32 %s1067_s27, 4  ;;  %s966_s14 = int_to_ptr.vmem [resolvable:$false] %s965_s14 }
  0x58   : > { %s967_s10 = scalar_lea.vmem %s966_s14, 256  ;;  %p968_p7 = scmp.lt.s32.totalorder %s1257_s7, %s966_s14 }
  0x59   : > { %p963_p11 = pnand %p961_p9, %p947_p12  ;;  %p969_p4 = scmp.lt.s32.totalorder %s967_s10, %s960_s15 }
  0x5b   : > { %p964_p0 = pneg %p963_p11  ;;  %p970_p13 = por %p969_p4, %p968_p7 }
  0x5d   : > { %p971_p6 = pnand %p970_p13, %p964_p0 }
  0x5f   : > { %974 = shalt.err (!%p971_p6)
}
  0x60   : > { %823 = dma.hbm_to_vmem [thread:$0]  (!%p1253_p2), %s1249_s24, 128, %s1257_s7, %s245_s11  }
  0x61   : > { %264 = sbr.rel (%p1156_p8) target bundleno = 619 (0x26b), region = 40  ;;  %s1287_s13 = sand.u32 (!%p1156_p8), 1, %s1045_s19  }
  0x62   : > { %s639_s25 = sshll.u32 (!%p1156_p8), %s1287_s13, 3  ;;  %s267_s16 = scalar_lea.sflag (!%p1156_p8), [#allocation3], %s1287_s13 }
  0x63   : > { %s1293_s17 = scalar_lea.vmem (!%p1156_p8), [#allocation2], %s639_s25  ;;  %p1399_p7 = scmp.ne.s32.totalorder (!%p1156_p8), %s1393_s28, 0 }
  0x68   : > { %1028 = dma.done.wait (%p1399_p7), %s267_s16, 128  }
  0x69   : > { %1030 = vsyncadd (%p1399_p7), %s267_s16, 4294967168  ;;  %p1400_p2 = scmp.ne.s32.totalorder %s1391_s26, 0 }
  0x6b   : > { %1032 = dma.done.wait (%p1400_p2), [#allocation6], 4096  }
  0x6c   : > { %1034 = vsyncadd (%p1400_p2), [#allocation6], 4294963200  ;;  %v1068_v0 = vmov 0.0|0.0   ;;  %vm1069_vm0 = vmmov 0   ;;  %v1070_v1 = vmov 0.0   ;;  %v314_v2 = vld [vmem:[#allocation5] sm:$0xff] }
  0x6d   : > { %753 = vmatprep.subr.bf16.mxu0 %v1068_v0  ;;  %715 = vmatprep.mubr.msk.f32.mxu0 %vm1069_vm0, %v1070_v1  ;;  %v315_v3 = vld [vmem:[#allocation5 + $0x8] sm:$0xff]  ;;  %v316_v5 = vld [vmem:[#allocation5 + $0x10] sm:$0xff]  ;;  %v317_v6 = vld [vmem:[#allocation5 + $0x18] sm:$0xff]  ;;  %s646_s7 = sshll.u32 %s1053_s21, 7  ;;  %s307_s9 = scalar_lea.vmem [#allocation8], %s639_s25 }
  0x6e   : > { %777 = vmatprep.subr.bf16.mxu1 %v1068_v0  ;;  %750 = vmatprep.mubr.msk.f32.mxu1 %vm1069_vm0, %v1070_v1  ;;  %v754_v4 = vpack.c.bf16 %v315_v3, %v314_v2  ;;  %v408_v7 = vld [vmem:[#allocation7] sm:$0xff]  ;;  %v409_v8 = vld [vmem:[#allocation7 + $0x8] sm:$0xff]  ;;  %v410_v9 = vld [vmem:[#allocation7 + $0x10] sm:$0xff]  ;;  %v757_v11 = vpack.c.bf16 %v317_v6, %v316_v5  ;;  %s516_s11 = sshll.u32 %s307_s9, 4  ;;  %s1332_s14 = scalar_lea.hbm %s1386_s5, %s646_s7  ;;  %s1334_s11 = int_to_ptr.vmem [resolvable:$true] %s516_s11 }
  0x6f   : > { %v411_v10 = vld [vmem:[#allocation7 + $0x18] sm:$0xff]  ;;  %v778_v12 = vpack.c.bf16 %v409_v8, %v408_v7  ;;  %v412_v14 = vld [vmem:[#allocation7 + $0x20] sm:$0xff]  ;;  %v413_v15 = vld [vmem:[#allocation7 + $0x28] sm:$0xff]  ;;  %s503_s10 = scalar_lea.sflag [#allocation4], %s1287_s13  ;;  %s975_s16 = scalar_lea.vmem %s1334_s11, 128 }
  0x70   : > { %755 = vmatpush3.bf16.xpose.msra.mxu0 %v754_v4  ;;  %v781_v13 = vpack.c.bf16 %v411_v10, %v410_v9  ;;  %v318_v16 = vld [vmem:[#allocation5 + $0x20] sm:$0xff]  ;;  %v319_v17 = vld [vmem:[#allocation5 + $0x28] sm:$0xff]  ;;  %v784_v18 = vpack.c.bf16 %v413_v15, %v412_v14  ;;  %v414_v19 = vld [vmem:[#allocation7 + $0x30] sm:$0xff]  ;;  %p976_p8 = scmp.ne.s32.totalorder %s1334_s11, %s975_s16  ;;  %p1401_p12 = scmp.ne.s32.totalorder %s1397_s8, 0 }
  0x71   : > { %756 = vmatprep.subr.bf16.mxu0 %v1068_v0  ;;  %779 = vmatpush3.bf16.msra.mxu1 %v778_v12  ;;  %v415_v20 = vld [vmem:[#allocation7 + $0x38] sm:$0xff]  ;;  %v760_v21 = vpack.c.bf16 %v319_v17, %v318_v16  ;;  %v416_v23 = vld [vmem:[#allocation7 + $0x40] sm:$0xff]  ;;  %v417_v24 = vld [vmem:[#allocation7 + $0x48] sm:$0xff]  ;;  %s1071_s21 = smov [#allocation8]  }
  0x72   : > { %780 = vmatprep.subr.bf16.mxu1 %v1068_v0  ;;  %v787_v22 = vpack.c.bf16 %v415_v20, %v414_v19  ;;  %v320_v25 = vld [vmem:[#allocation5 + $0x30] sm:$0xff]  ;;  %v321_v26 = vld [vmem:[#allocation5 + $0x38] sm:$0xff]  ;;  %v790_v27 = vpack.c.bf16 %v417_v24, %v416_v23  ;;  %v420_v32 = vld [vmem:[#allocation7 + $0x60] sm:$0xff]  ;;  %p977_p1 = pnand %p976_p8, %p1401_p12  ;;  %s979_s25 = sshll.u32 %s1071_s21, 4  ;;  %s980_s25 = int_to_ptr.vmem [resolvable:$false] %s979_s25 }
  0x73   : > { %v418_v28 = vld [vmem:[#allocation7 + $0x50] sm:$0xff]  ;;  %v419_v29 = vld [vmem:[#allocation7 + $0x58] sm:$0xff]  ;;  %v763_v30 = vpack.c.bf16 %v321_v26, %v320_v25  ;;  %v421_v33 = vld [vmem:[#allocation7 + $0x68] sm:$0xff]  ;;  %p982_p3 = scmp.lt.s32.totalorder %s1334_s11, %s980_s25 }
  0x74   : > { %v793_v31 = vpack.c.bf16 %v419_v29, %v418_v28  ;;  %v322_v34 = vld [vmem:[#allocation5 + $0x40] sm:$0xff]  ;;  %v323_v35 = vld [vmem:[#allocation5 + $0x48] sm:$0xff]  ;;  %v796_v36 = vpack.c.bf16 %v421_v33, %v420_v32  ;;  %v324_v38 = vld [vmem:[#allocation5 + $0x50] sm:$0xff]  ;;  %p978_p10 = pneg %p977_p1 }
  0x75   : > { %782 = vmatpush3.bf16.msra.mxu1 %v781_v13  ;;  %v766_v37 = vpack.c.bf16 %v323_v35, %v322_v34  ;;  %v325_v39 = vld [vmem:[#allocation5 + $0x58] sm:$0xff]  ;;  %v326_v41 = vld [vmem:[#allocation5 + $0x60] sm:$0xff]  ;;  %v327_v42 = vld [vmem:[#allocation5 + $0x68] sm:$0xff] }
  0x76   : > { %783 = vmatprep.subr.bf16.mxu1 %v1068_v0  ;;  %v769_v40 = vpack.c.bf16 %v325_v39, %v324_v38  ;;  %v772_v43 = vpack.c.bf16 %v327_v42, %v326_v41  ;;  %v328_v44 = vld [vmem:[#allocation5 + $0x70] sm:$0xff]  ;;  %v329_v45 = vld [vmem:[#allocation5 + $0x78] sm:$0xff] }
  0x77   : > { %v775_v46 = vpack.c.bf16 %v329_v45, %v328_v44  ;;  %v313_v47 = vld [vmem:[%s1293_s17] sm:$0xff]  ;;  %s981_s17 = scalar_lea.vmem %s980_s25, 256 }
  0x78   : > { %758 = vmatpush3.bf16.xpose.msra.mxu0 %v757_v11  ;;  %v422_v48 = vld [vmem:[#allocation7 + $0x70] sm:$0xff]  ;;  %v423_v49 = vld [vmem:[#allocation7 + $0x78] sm:$0xff]  ;;  %p983_p5 = scmp.lt.s32.totalorder %s981_s17, %s975_s16 }
  0x79   : > { %759 = vmatprep.subr.bf16.mxu0 %v1068_v0  ;;  %785 = vmatpush3.bf16.msra.mxu1 %v784_v18  ;;  %v799_v50 = vpack.c.bf16 %v423_v49, %v422_v48  ;;  %v643_v51 = vld [vmem:[%s1383_s2] ss:$0 sm:$0xff] }
  0x7a   : > { %786 = vmatprep.subr.bf16.mxu1 %v1068_v0  ;;  %v644_v56 = vld [vmem:[%s1385_s4] ss:$0 sm:$0xff]  ;;  %p984_p9 = por %p983_p5, %p982_p3 }
  0x7c   : > { %p985_p11 = pnand %p984_p9, %p978_p10 }
  0x7d   : > { %788 = vmatpush3.bf16.msra.mxu1 %v787_v22 }
  0x7e   : > { %789 = vmatprep.subr.bf16.mxu1 %v1068_v0 }
  0x80   : > { %761 = vmatpush3.bf16.xpose.msra.mxu0 %v760_v21 }
  0x81   : > { %762 = vmatprep.subr.bf16.mxu0 %v1068_v0  ;;  %791 = vmatpush3.bf16.msra.mxu1 %v790_v27 }
  0x82   : > { %792 = vmatprep.subr.bf16.mxu1 %v1068_v0 }
  0x85   : > { %794 = vmatpush3.bf16.msra.mxu1 %v793_v31 }
  0x86   : > { %795 = vmatprep.subr.bf16.mxu1 %v1068_v0 }
  0x88   : > { %764 = vmatpush3.bf16.xpose.msra.mxu0 %v763_v30 }
  0x89   : > { %765 = vmatprep.subr.bf16.mxu0 %v1068_v0  ;;  %797 = vmatpush3.bf16.msra.mxu1 %v796_v36 }
  0x8a   : > { %798 = vmatprep.subr.bf16.mxu1 %v1068_v0 }
  0x8d   : > { %800 = vmatpush3.bf16.msra.mxu1 %v799_v50 }
  0x90   : > { %767 = vmatpush3.bf16.xpose.msra.mxu0 %v766_v37 }
  0x91   : > { %768 = vmatprep.subr.bf16.mxu0 %v1068_v0 }
  0x98   : > { %770 = vmatpush3.bf16.xpose.msra.mxu0 %v769_v40 }
  0x99   : > { %771 = vmatprep.subr.bf16.mxu0 %v1068_v0 }
  0xa0   : > { %773 = vmatpush3.bf16.xpose.msra.mxu0 %v772_v43 }
  0xa1   : > { %774 = vmatprep.subr.bf16.mxu0 %v1068_v0 }
  0xa8   : > { %776 = vmatpush3.bf16.xpose.msra.mxu0 %v775_v46 }
  0xaf   : > { %716 = vmatmul.mubr.f32.vlgmr.msra.gmra.mrb[0].mxu0 %v313_v47 }
 0x182   : > { %v403_v52 = vpop.f32.mrb[0].mxu0 }
 0x183   : > { %v404_v53 = vadd.f32 %v643_v51, %v403_v52  ;;  %v717_v54 = vpop.f32.mrb[1].mxu0 }
 0x185   : > { %v407_v55 = vmax.f32 %v404_v53, 0.0 }
 0x187   : > { %751 = vmatmul.mubr.f32.vlgmr.msra.gmra.mrb[0].mxu1 %v407_v55 }
 0x25a   : > { %v497_v57 = vpop.f32.mrb[0].mxu1 }
 0x25b   : > { %v498_v58 = vadd.f32 %v644_v56, %v497_v57  ;;  %v752_v59 = vpop.f32.mrb[1].mxu1 }
 0x25d   : > { %501 = vst [vmem:[%s307_s9] sm:$0xff] %v498_v58 }
 0x25e   : > { %988 = shalt.err (!%p985_p11)
}
 0x25f   : > { %s989_s13 = scalar_lea.hbm %s1332_s14, 128  ;;  %s993_s30 = scalar_lea.hbm %s1386_s5, 256 }
 0x260   : > { %p990_p0 = scmp.ne.s32.totalorder %s1332_s14, %s989_s13  ;;  %p994_p6 = scmp.lt.u32.totalorder %s1332_s14, %s1386_s5 }
 0x261   : > { %p995_p7 = scmp.lt.u32.totalorder %s993_s30, %s989_s13  ;;  %p997_p8 = scmp.lt.u32.totalorder %s989_s13, %s1332_s14 }
 0x262   : > { %p991_p4 = pnand %p990_p0, %p1401_p12 }
 0x263   : > { %p996_p2 = por %p995_p7, %p994_p6 }
 0x264   : > { %p992_p13 = pneg %p991_p4 }
 0x265   : > { %p998_p1 = por %p997_p8, %p996_p2 }
 0x267   : > { %p999_p10 = pnand %p998_p1, %p992_p13 }
 0x269   : > { %1002 = shalt.err (!%p999_p10)
}
 0x26a   : > { %811 = dma.vmem_to_hbm [thread:$0]  (%p1401_p12), %s1334_s11, 128, %s1332_s14, %s503_s10  }
 0x26b PF: > { %s528_s9 = sand.u32 1, %s1041_s18   ;;  %p1402_p3 = scmp.ne.s32.totalorder %s1394_s29, 0 }
 0x26c   : > { %p1403_p5 = scmp.ge.s32.totalorder %s1061_s23, 2  ;;  %s529_s15 = scalar_lea.sflag [#allocation4], %s528_s9 }
 0x26e   : > { %p825_p9 = pnand %p1403_p5, %p1402_p3 }
 0x270   : > { %1036 = dma.done.wait (!%p825_p9), %s529_s15, 128  }
 0x271   : > { %1038 = vsyncadd (!%p825_p9), %s529_s15, 4294967168  ;;  %s22_s23 = sadd.s32 1, %s1061_s23   ;;  %s1404_s18 = smov %s1045_s19 }
 0x272   : > { %p19_p11 = scmp.ge.s32.totalorder %s22_s23, 4   ;;  %s1405_s19 = smov %s1049_s20 }
 0x273   : > { %s1406_s20 = smov %s1244_s6  ;;  %s1407_s21 = smov %s1057_s22 }
 0x274   : > { %s1408_s22 = smov %s1410_s12  ;;  %21 = sbr.rel (!%p19_p11) target bundleno = 7 (0x7), region = 98 }
 0x27b   :  { %534 = vsyncpa [#allocation3], 1 }
 0x27c   :  { %536 = vsyncpa [#allocation3 + $0x1], 1 }
 0x27d   :  { %537 = vsyncpa [#allocation6], 1 }
 0x27e   :  { %538 = vsyncpa [#allocation4], 1 }
 0x27f   :  { %540 = vsyncpa [#allocation4 + $0x1], 1 }

</bundles_post_ra>
